<compile_context>
chip_gen: v7x
topology: tpu7x:2x2x1
jax: 0.10.0
libtpu: 0.0.40
codegen_flags: <defaults>
</compile_context>

<pallas_src>
import jax
import jax.numpy as jnp
from jax.experimental import pallas as pl
from jax.experimental.pallas import tpu as pltpu

# Original (PyTorch) feature sizes.
IN_FEATURES = 28 * 28            # 784
H1, H2, OUT = 300, 200, 10
# Lane-padded (multiple-of-128) feature sizes used inside the kernel.
H1_PAD, H2_PAD, OUT_PAD = 384, 256, 128

TB_MAX = 1024                    # max batch-tile rows (VMEM @ TB=1024 ~= 12 MiB)


def _round_up(x, m):
    return (x + m - 1) // m * m


def _choose_tb(B):
    """Batch tile: multiple of 16, <= TB_MAX, keeping >=2 grid steps when possible."""
    b16 = _round_up(max(B, 1), 16)
    if b16 <= 16:
        return 16                                    # too small to split
    if b16 <= 2 * TB_MAX:
        return _round_up((b16 + 1) // 2, 16)         # exactly 2 grid steps
    return TB_MAX


def _sigmoid(h):
    # exp and reciprocal both go to the EUP slot (approx recip is nearly free).
    return pl.reciprocal(1.0 + jnp.exp(-h), approx=True)


def make_mlp_kernel(tb, n_sub):
    """Kernel for one (tb, 784) f32 batch tile, processed as n_sub sub-chunks."""
    assert tb % n_sub == 0
    tb_sub = tb // n_sub

    def mlp_kernel(x_ref, w1_ref, b1_ref, w2_ref, b2_ref, w3_ref, b3_ref, o_ref):
        # Static unroll over sub-chunks: the two dependency chains interleave,
        # so MXU pushes of chunk k+1 overlap VPU/EUP work of chunk k.
        for c in range(n_sub):
            r0 = c * tb_sub
            x = x_ref[pl.ds(r0, tb_sub), :].astype(jnp.bfloat16)     # (tb_sub, 784)

            h1 = jnp.dot(x, w1_ref[...], preferred_element_type=jnp.float32)
            h1 = _sigmoid(h1 + b1_ref[...])                          # (tb_sub, 384) f32
            # Padded h1 columns are sigmoid(0)=0.5 but the matching rows of the
            # padded W2 are zero, so they contribute nothing downstream.

            h2 = jnp.dot(h1.astype(jnp.bfloat16), w2_ref[...],
                         preferred_element_type=jnp.float32)
            h2 = _sigmoid(h2 + b2_ref[...])                          # (tb_sub, 256) f32

            logits = jnp.dot(h2.astype(jnp.bfloat16), w3_ref[...],
                             preferred_element_type=jnp.float32)
            logits = logits + b3_ref[...]                            # (tb_sub, 128) f32

            # Padded logit lanes (>= 10) must NOT contribute to max/exp/sum.
            lane = jax.lax.broadcasted_iota(jnp.int32, logits.shape, 1)
            logits = jnp.where(lane < OUT, logits, -jnp.inf)

            # log_softmax over dim=1 (last axis), numerically stable.
            m = jnp.max(logits, axis=-1, keepdims=True)
            shifted = logits - m
            lse = jnp.log(jnp.sum(jnp.exp(shifted), axis=-1, keepdims=True))
            o_ref[pl.ds(r0, tb_sub), :] = (shifted - lse).astype(o_ref.dtype)

    return mlp_kernel


def prepare_params(params):
    """One-time transpose/pad/bf16-cast of PyTorch-layout params (hoisted out of forward)."""
    w1, b1, w2, b2, w3, b3 = params

    def pad_w(w_pt, in_pad, out_pad):
        w = jnp.transpose(w_pt)                                      # (in, out)
        w = jnp.pad(w, ((0, in_pad - w.shape[0]), (0, out_pad - w.shape[1])))
        return w.astype(jnp.bfloat16)

    def pad_b(b, out_pad):
        return jnp.pad(b, (0, out_pad - b.shape[0])).astype(jnp.float32)[None, :]

    return (pad_w(w1, IN_FEATURES, H1_PAD), pad_b(b1, H1_PAD),
            pad_w(w2, H1_PAD, H2_PAD),      pad_b(b2, H2_PAD),
            pad_w(w3, H2_PAD, OUT_PAD),     pad_b(b3, OUT_PAD))


def neural_network_forward(x_nchw, prepared_params):
    """x_nchw: (B, 1, 28, 28) float32 -> (B, 10) float32 log-probabilities."""
    w1p, b1p, w2p, b2p, w3p, b3p = prepared_params
    B = x_nchw.shape[0]

    # nn.Flatten: row-major over C,H,W -> (B, 784). Stays f32; the bf16 cast
    # happens inside the kernel (no extra XLA pass over x).
    x = x_nchw.reshape(B, IN_FEATURES)

    TB = _choose_tb(B)
    B_pad = _round_up(B, TB)
    if B_pad != B:
        x = jnp.pad(x, ((0, B_pad - B), (0, 0)))
    grid = (B_pad // TB,)
    n_sub = 2 if (TB >= 32 and TB % 32 == 0) else 1

    x_spec = pl.BlockSpec((TB, IN_FEATURES), lambda i: (i, 0))
    out_spec = pl.BlockSpec((TB, OUT_PAD), lambda i: (i, 0))

    # Full-array block + constant index_map => DMA'd once, VMEM-resident across
    # the whole batch grid; single-buffered (no need to double-buffer constants).
    def resident(shape):
        return pl.BlockSpec(shape, lambda i: (0, 0), pipeline_mode=pl.Buffered(1))

    cost = pl.CostEstimate(
        flops=2 * B_pad * (IN_FEATURES * H1_PAD + H1_PAD * H2_PAD + H2_PAD * OUT_PAD),
        transcendentals=B_pad * (2 * H1_PAD + 2 * H2_PAD + OUT_PAD),
        bytes_accessed=(x.size * 4                                   # f32 x stream
                        + (w1p.size + w2p.size + w3p.size) * 2       # bf16 weights
                        + (b1p.size + b2p.size + b3p.size) * 4       # f32 biases
                        + B_pad * OUT_PAD * 4),                      # f32 output
    )

    out_padded = pl.pallas_call(
        make_mlp_kernel(TB, n_sub),
        out_shape=jax.ShapeDtypeStruct((B_pad, OUT_PAD), jnp.float32),
        grid_spec=pltpu.PrefetchScalarGridSpec(
            num_scalar_prefetch=0,
            grid=grid,
            in_specs=[
                x_spec,
                resident((IN_FEATURES, H1_PAD)), resident((1, H1_PAD)),
                resident((H1_PAD, H2_PAD)),      resident((1, H2_PAD)),
                resident((H2_PAD, OUT_PAD)),     resident((1, OUT_PAD)),
            ],
            out_specs=out_spec,
        ),
        compiler_params=pltpu.CompilerParams(
            dimension_semantics=("parallel",)),
        cost_estimate=cost,
    )(x, w1p, b1p, w2p, b2p, w3p, b3p)

    # Drop padded batch rows and padded (-inf) logit lanes — mandatory slice.
    return out_padded[:B, :OUT]


def init_params(key):
    """PyTorch-layout params with nn.Linear's U(-1/sqrt(fan_in), 1/sqrt(fan_in)) init."""
    def linear(k, fan_in, fan_out):
        kw, kb = jax.random.split(k)
        bound = 1.0 / jnp.sqrt(fan_in)
        w = jax.random.uniform(kw, (fan_out, fan_in), jnp.float32, -bound, bound)
        b = jax.random.uniform(kb, (fan_out,), jnp.float32, -bound, bound)
        return w, b

    k1, k2, k3 = jax.random.split(key, 3)
    w1, b1 = linear(k1, IN_FEATURES, H1)
    w2, b2 = linear(k2, H1, H2)
    w3, b3 = linear(k3, H2, OUT)
    return (w1, b1, w2, b2, w3, b3)


def _reference_forward(x_nchw, params):
    """Pure-JAX f32 reference matching the PyTorch module exactly."""
    w1, b1, w2, b2, w3, b3 = params
    x = x_nchw.reshape(x_nchw.shape[0], -1)
    h1 = jax.nn.sigmoid(x @ w1.T + b1)
    h2 = jax.nn.sigmoid(h1 @ w2.T + b2)
    logits = h2 @ w3.T + b3
    return jax.nn.log_softmax(logits, axis=-1)


if __name__ == "__main__":
    key = jax.random.PRNGKey(0)
    kx, kp = jax.random.split(key)

    # Small batch of MNIST-shaped inputs, NCHW like PyTorch.
    x = jax.random.normal(kx, (2, 1, 28, 28), dtype=jnp.float32)
    params = init_params(kp)

    # Weight prep is hoisted: done once, reused by every forward call.
    prepared = jax.block_until_ready(prepare_params(params))

    out = neural_network_forward(x, prepared)
    out = jax.block_until_ready(out)

    assert out.shape == (2, 10)
    # log-softmax rows should (approximately) exp-sum to 1.
    assert jnp.allclose(jnp.sum(jnp.exp(out), axis=-1), 1.0, atol=1e-3)
    # Close to the f32 reference (bf16 matmul operands + approx recip -> loose tol).
    ref = _reference_forward(x, params)
    assert jnp.allclose(out, ref, atol=7e-2), float(jnp.max(jnp.abs(out - ref)))
    print("KERNEL_OK")
</pallas_src>

<mosaic_0001>
module attributes {stable_mosaic.version = 11 : i64} {
  func.func @mlp_kernel(%arg0: i32, %arg1: memref<16x784xf32, #tpu.memory_space<vmem>>, %arg2: memref<784x384xbf16, #tpu.memory_space<vmem>>, %arg3: memref<1x384xf32, #tpu.memory_space<vmem>>, %arg4: memref<384x256xbf16, #tpu.memory_space<vmem>>, %arg5: memref<1x256xf32, #tpu.memory_space<vmem>>, %arg6: memref<256x128xbf16, #tpu.memory_space<vmem>>, %arg7: memref<1x128xf32, #tpu.memory_space<vmem>>, %arg8: memref<16x128xf32, #tpu.memory_space<vmem>>) attributes {dimension_semantics = [#tpu.dimension_semantics<parallel>], iteration_bounds = array<i64: 1>, scalar_prefetch = 0 : i64, scratch_operands = 0 : i64, tpu.core_type = #tpu.core_type<tc>, window_params = [{transform_indices = @transform_0, window_bounds = array<i64: 16, 784>}, {pipeline_mode = #tpu.pipeline_mode<synchronous>, transform_indices = @transform_1, window_bounds = array<i64: 784, 384>}, {pipeline_mode = #tpu.pipeline_mode<synchronous>, transform_indices = @transform_2, window_bounds = array<i64: 1, 384>}, {pipeline_mode = #tpu.pipeline_mode<synchronous>, transform_indices = @transform_3, window_bounds = array<i64: 384, 256>}, {pipeline_mode = #tpu.pipeline_mode<synchronous>, transform_indices = @transform_4, window_bounds = array<i64: 1, 256>}, {pipeline_mode = #tpu.pipeline_mode<synchronous>, transform_indices = @transform_5, window_bounds = array<i64: 256, 128>}, {pipeline_mode = #tpu.pipeline_mode<synchronous>, transform_indices = @transform_6, window_bounds = array<i64: 1, 128>}, {transform_indices = @transform_7, window_bounds = array<i64: 16, 128>}]} {
    %c0 = arith.constant 0 : index
    %c0_0 = arith.constant 0 : index
    %0 = vector.load %arg1[%c0, %c0_0] : memref<16x784xf32, #tpu.memory_space<vmem>>, vector<16x784xf32>
    %1 = arith.truncf %0 : vector<16x784xf32> to vector<16x784xbf16>
    %c0_1 = arith.constant 0 : index
    %c0_2 = arith.constant 0 : index
    %2 = vector.load %arg2[%c0_1, %c0_2] : memref<784x384xbf16, #tpu.memory_space<vmem>>, vector<784x384xbf16>
    %cst = arith.constant dense<0.000000e+00> : vector<16x384xf32>
    %3 = tpu.matmul %1, %2, %cst {dimension_numbers = #tpu.dot_dimension_numbers<[1], [0], [0], [1], [0, 0, 1, 1], [], []>} : vector<16x784xbf16>, vector<784x384xbf16>, vector<16x384xf32> -> vector<16x384xf32>
    %c0_3 = arith.constant 0 : index
    %c0_4 = arith.constant 0 : index
    %4 = vector.load %arg3[%c0_3, %c0_4] : memref<1x384xf32, #tpu.memory_space<vmem>>, vector<1x384xf32>
    %5 = vector.broadcast %4 : vector<1x384xf32> to vector<16x384xf32>
    %6 = arith.addf %3, %5 : vector<16x384xf32>
    %cst_5 = arith.constant 0.000000e+00 : f32
    %7 = vector.broadcast %cst_5 : f32 to vector<16x384xf32>
    %8 = arith.subf %7, %6 : vector<16x384xf32>
    %9 = math.exp %8 : vector<16x384xf32>
    %cst_6 = arith.constant 1.000000e+00 : f32
    %10 = vector.broadcast %cst_6 : f32 to vector<16x384xf32>
    %11 = arith.addf %10, %9 : vector<16x384xf32>
    %12 = tpu.reciprocal %11 {approx = true} : vector<16x384xf32> -> vector<16x384xf32>
    %13 = arith.truncf %12 : vector<16x384xf32> to vector<16x384xbf16>
    %c0_7 = arith.constant 0 : index
    %c0_8 = arith.constant 0 : index
    %14 = vector.load %arg4[%c0_7, %c0_8] : memref<384x256xbf16, #tpu.memory_space<vmem>>, vector<384x256xbf16>
    %cst_9 = arith.constant dense<0.000000e+00> : vector<16x256xf32>
    %15 = tpu.matmul %13, %14, %cst_9 {dimension_numbers = #tpu.dot_dimension_numbers<[1], [0], [0], [1], [0, 0, 1, 1], [], []>} : vector<16x384xbf16>, vector<384x256xbf16>, vector<16x256xf32> -> vector<16x256xf32>
    %c0_10 = arith.constant 0 : index
    %c0_11 = arith.constant 0 : index
    %16 = vector.load %arg5[%c0_10, %c0_11] : memref<1x256xf32, #tpu.memory_space<vmem>>, vector<1x256xf32>
    %17 = vector.broadcast %16 : vector<1x256xf32> to vector<16x256xf32>
    %18 = arith.addf %15, %17 : vector<16x256xf32>
    %cst_12 = arith.constant 0.000000e+00 : f32
    %19 = vector.broadcast %cst_12 : f32 to vector<16x256xf32>
    %20 = arith.subf %19, %18 : vector<16x256xf32>
    %21 = math.exp %20 : vector<16x256xf32>
    %cst_13 = arith.constant 1.000000e+00 : f32
    %22 = vector.broadcast %cst_13 : f32 to vector<16x256xf32>
    %23 = arith.addf %22, %21 : vector<16x256xf32>
    %24 = tpu.reciprocal %23 {approx = true} : vector<16x256xf32> -> vector<16x256xf32>
    %25 = arith.truncf %24 : vector<16x256xf32> to vector<16x256xbf16>
    %c0_14 = arith.constant 0 : index
    %c0_15 = arith.constant 0 : index
    %26 = vector.load %arg6[%c0_14, %c0_15] : memref<256x128xbf16, #tpu.memory_space<vmem>>, vector<256x128xbf16>
    %cst_16 = arith.constant dense<0.000000e+00> : vector<16x128xf32>
    %27 = tpu.matmul %25, %26, %cst_16 {dimension_numbers = #tpu.dot_dimension_numbers<[1], [0], [0], [1], [0, 0, 1, 1], [], []>} : vector<16x256xbf16>, vector<256x128xbf16>, vector<16x128xf32> -> vector<16x128xf32>
    %c0_17 = arith.constant 0 : index
    %c0_18 = arith.constant 0 : index
    %28 = vector.load %arg7[%c0_17, %c0_18] : memref<1x128xf32, #tpu.memory_space<vmem>>, vector<1x128xf32>
    %29 = vector.broadcast %28 : vector<1x128xf32> to vector<16x128xf32>
    %30 = arith.addf %27, %29 : vector<16x128xf32>
    %31 = tpu.iota {dimensions = array<i32: 1>} : vector<16x128xi32>
    %c10_i32 = arith.constant 10 : i32
    %32 = vector.broadcast %c10_i32 : i32 to vector<16x128xi32>
    %33 = arith.cmpi slt, %31, %32 : vector<16x128xi32>
    %cst_19 = arith.constant 0xFF800000 : f32
    %34 = vector.broadcast %cst_19 : f32 to vector<16x128xf32>
    %35 = arith.select %33, %30, %34 : vector<16x128xi1>, vector<16x128xf32>
    %cst_20 = arith.constant dense<0xFF800000> : vector<16xf32>
    %36 = vector.multi_reduction <maximumf>, %35, %cst_20 [1] : vector<16x128xf32> to vector<16xf32>
    %37 = vector.shape_cast %36 : vector<16xf32> to vector<16x1xf32>
    %38 = vector.broadcast %37 : vector<16x1xf32> to vector<16x128xf32>
    %39 = arith.subf %35, %38 : vector<16x128xf32>
    %40 = math.exp %39 : vector<16x128xf32>
    %cst_21 = arith.constant dense<0.000000e+00> : vector<16xf32>
    %41 = vector.multi_reduction <add>, %40, %cst_21 [1] : vector<16x128xf32> to vector<16xf32>
    %42 = vector.shape_cast %41 : vector<16xf32> to vector<16x1xf32>
    %43 = math.log %42 : vector<16x1xf32>
    %44 = vector.broadcast %43 : vector<16x1xf32> to vector<16x128xf32>
    %45 = arith.subf %39, %44 : vector<16x128xf32>
    %c0_22 = arith.constant 0 : index
    %c0_23 = arith.constant 0 : index
    %46 = vector.load %arg8[%c0_22, %c0_23] : memref<16x128xf32, #tpu.memory_space<vmem>>, vector<16x128xf32>
    tpu.vector_store %arg8[%c0_22, %c0_23], %45 {strides = array<i32>} : memref<16x128xf32, #tpu.memory_space<vmem>>, vector<16x128xf32>,
    return
  }
  func.func @transform_0(%arg0: i32) -> (i32, i32) {
    %c0_i32 = arith.constant 0 : i32
    %c0_i32_0 = arith.constant 0 : i32
    return %arg0, %c0_i32 : i32, i32
  }
  func.func @transform_1(%arg0: i32) -> (i32, i32) {
    %c0_i32 = arith.constant 0 : i32
    %c0_i32_0 = arith.constant 0 : i32
    %c0_i32_1 = arith.constant 0 : i32
    return %c0_i32, %c0_i32_0 : i32, i32
  }
  func.func @transform_2(%arg0: i32) -> (i32, i32) {
    %c0_i32 = arith.constant 0 : i32
    %c0_i32_0 = arith.constant 0 : i32
    %c0_i32_1 = arith.constant 0 : i32
    return %c0_i32, %c0_i32_0 : i32, i32
  }
  func.func @transform_3(%arg0: i32) -> (i32, i32) {
    %c0_i32 = arith.constant 0 : i32
    %c0_i32_0 = arith.constant 0 : i32
    %c0_i32_1 = arith.constant 0 : i32
    return %c0_i32, %c0_i32_0 : i32, i32
  }
  func.func @transform_4(%arg0: i32) -> (i32, i32) {
    %c0_i32 = arith.constant 0 : i32
    %c0_i32_0 = arith.constant 0 : i32
    %c0_i32_1 = arith.constant 0 : i32
    return %c0_i32, %c0_i32_0 : i32, i32
  }
  func.func @transform_5(%arg0: i32) -> (i32, i32) {
    %c0_i32 = arith.constant 0 : i32
    %c0_i32_0 = arith.constant 0 : i32
    %c0_i32_1 = arith.constant 0 : i32
    return %c0_i32, %c0_i32_0 : i32, i32
  }
  func.func @transform_6(%arg0: i32) -> (i32, i32) {
    %c0_i32 = arith.constant 0 : i32
    %c0_i32_0 = arith.constant 0 : i32
    %c0_i32_1 = arith.constant 0 : i32
    return %c0_i32, %c0_i32_0 : i32, i32
  }
  func.func @transform_7(%arg0: i32) -> (i32, i32) {
    %c0_i32 = arith.constant 0 : i32
    %c0_i32_0 = arith.constant 0 : i32
    return %arg0, %c0_i32 : i32, i32
  }
}

</mosaic_0001>

<bundles_post_ra>
// kernel: tpu_custom_call.1
= control target key start
LH: loop header
LB: loop body
LE: loop exit
PB: predicated region body
PF: predicated region fallthrough
CT: control target
= control target key end

     0   :  { %12 = vsyncpa [#allocation3], 0  ;;  %s3092_s0 = inlined_call_operand.hbm [shape: f32[16,784], index: 0, kind: input, shape index: {}]   ;;  %s3093_s1 = inlined_call_operand.hbm [shape: bf16[784,384], index: 1, kind: input, shape index: {}]   ;;  %s3094_s2 = inlined_call_operand.vmem [shape: f32[1,384], index: 2, kind: input, shape index: {}]   ;;  %s3095_s3 = inlined_call_operand.hbm [shape: bf16[384,256], index: 3, kind: input, shape index: {}]   ;;  %s3096_s4 = inlined_call_operand.vmem [shape: f32[1,256], index: 4, kind: input, shape index: {}]   ;;  %s3097_s5 = inlined_call_operand.hbm [shape: bf16[256,128], index: 5, kind: input, shape index: {}]   ;;  %s3098_s6 = inlined_call_operand.vmem [shape: f32[1,128], index: 6, kind: input, shape index: {}]   ;;  %s3099_s7 = inlined_call_operand.hbm [shape: f32[16,128], index: 7, kind: output, shape index: {}]  }
   0x1   :  { %13 = vsyncpa [#allocation6], 0 }
   0x2   :  { %14 = vsyncpa [#allocation9], 0 }
   0x3   :  { %15 = vsyncpa [#allocation4], 0  ;;  %s2904_s24 = smov [#allocation5]   ;;  %s2786_s28 = scalar_lea.hbm %s3093_s1, 18816 }
   0x4   :  { %s33_s25 = sshll.u32 %s2904_s24, 4  ;;  %p2787_p0 = scmp.ne.s32.totalorder %s3093_s1, %s2786_s28  ;;  %s34_s25 = int_to_ptr.vmem [resolvable:$true] %s33_s25 }
   0x5   :  { %p2790_p1 = scmp.lt.u32.totalorder %s2786_s28, %s3093_s1 }
   0x7   :  { %p2792_p2 = pnand %p2790_p1, %p2787_p0 }
   0x9   :  { %2795 = shalt.err (!%p2792_p2)
}
   0xa   :  { %s2796_s10 = scalar_lea.vmem %s34_s25, 18816  ;;  %p2801_p4 = scmp.lt.s32.totalorder %s34_s25, %s34_s25 }
   0xb   :  { %p2797_p3 = scmp.ne.s32.totalorder %s34_s25, %s2796_s10  ;;  %p2802_p5 = scmp.lt.s32.totalorder %s2796_s10, %s2796_s10 }
   0xd   :  { %p2803_p6 = por %p2802_p5, %p2801_p4 }
   0xf   :  { %p2804_p7 = pnand %p2803_p6, %p2797_p3 }
  0x11   :  { %2807 = shalt.err (!%p2804_p7)
}
  0x12   :  { %s2905_s11 = smov 192   ;;  %s2906_s12 = smov 12  }
  0x13   :  { %39 = dma.hbm_to_vmem [thread:$0]  %s3093_s1, 18816, %s34_s25, [#allocation6], %s2905_s11, %s2905_s11, %s2906_s12  }
  0x14   :  { %s2907_s15 = smov [#allocation2]   ;;  %s2808_s19 = scalar_lea.hbm %s3092_s0, 1792 }
  0x15   :  { %s21_s16 = sshll.u32 %s2907_s15, 4  ;;  %p2809_p8 = scmp.ne.s32.totalorder %s3092_s0, %s2808_s19  ;;  %s22_s16 = int_to_ptr.vmem [resolvable:$true] %s21_s16 }
  0x16   :  { %p2812_p9 = scmp.lt.u32.totalorder %s2808_s19, %s3092_s0 }
  0x18   :  { %p2814_p10 = pnand %p2812_p9, %p2809_p8 }
  0x1a   :  { %2817 = shalt.err (!%p2814_p10)
}
  0x1b   :  { %s2818_s24 = scalar_lea.vmem %s22_s16, 1792  ;;  %p2823_p12 = scmp.lt.s32.totalorder %s22_s16, %s22_s16 }
  0x1c   :  { %p2819_p11 = scmp.ne.s32.totalorder %s22_s16, %s2818_s24  ;;  %p2824_p13 = scmp.lt.s32.totalorder %s2818_s24, %s2818_s24 }
  0x1e   :  { %p2825_p0 = por %p2824_p13, %p2823_p12 }
  0x20   :  { %p2826_p1 = pnand %p2825_p0, %p2819_p11 }
  0x22   :  { %2829 = shalt.err (!%p2826_p1)
}
  0x23   :  { %s2908_s1 = smov 896   ;;  %s2909_s25 = smov 56  }
  0x24   :  { %27 = dma.hbm_to_vmem [thread:$0]  %s3092_s0, 1792, %s22_s16, [#allocation3], %s2908_s1, %s2908_s1, %s2909_s25  }
  0x25   :  { %s2910_s28 = smov [#allocation7]   ;;  %s2830_s9 = scalar_lea.hbm %s3095_s3, 6144 }
  0x26   :  { %s47_s29 = sshll.u32 %s2910_s28, 4  ;;  %p2831_p2 = scmp.ne.s32.totalorder %s3095_s3, %s2830_s9  ;;  %s48_s29 = int_to_ptr.vmem [resolvable:$true] %s47_s29 }
  0x27   :  { %p2834_p3 = scmp.lt.u32.totalorder %s2830_s9, %s3095_s3 }
  0x29   :  { %p2836_p4 = pnand %p2834_p3, %p2831_p2 }
  0x2b   :  { %2839 = shalt.err (!%p2836_p4)
}
  0x2c   :  { %s2840_s14 = scalar_lea.vmem %s48_s29, 6144  ;;  %p2845_p6 = scmp.lt.s32.totalorder %s48_s29, %s48_s29 }
  0x2d   :  { %p2841_p5 = scmp.ne.s32.totalorder %s48_s29, %s2840_s14  ;;  %p2846_p7 = scmp.lt.s32.totalorder %s2840_s14, %s2840_s14 }
  0x2f   :  { %p2847_p8 = por %p2846_p7, %p2845_p6 }
  0x31   :  { %p2848_p9 = pnand %p2847_p8, %p2841_p5 }
  0x33   :  { %2851 = shalt.err (!%p2848_p9)
}
  0x34   :  { %s2911_s0 = smov 128   ;;  %s2912_s15 = smov 8  }
  0x35   :  { %53 = dma.hbm_to_vmem [thread:$0]  %s3095_s3, 6144, %s48_s29, [#allocation6], %s2911_s0, %s2911_s0, %s2912_s15  }
  0x36   :  { %s2913_s18 = smov [#allocation8]   ;;  %s2852_s22 = scalar_lea.hbm %s3097_s5, 2048 }
  0x37   :  { %s61_s19 = sshll.u32 %s2913_s18, 4  ;;  %p2853_p10 = scmp.ne.s32.totalorder %s3097_s5, %s2852_s22  ;;  %s62_s19 = int_to_ptr.vmem [resolvable:$true] %s61_s19 }
  0x38   :  { %p2856_p11 = scmp.lt.u32.totalorder %s2852_s22, %s3097_s5 }
  0x3a   :  { %p2858_p12 = pnand %p2856_p11, %p2853_p10 }
  0x3c   :  { %2861 = shalt.err (!%p2858_p12)
}
  0x3d   :  { %s2862_s26 = scalar_lea.vmem %s62_s19, 2048  ;;  %p2867_p0 = scmp.lt.s32.totalorder %s62_s19, %s62_s19 }
  0x3e   :  { %p2863_p13 = scmp.ne.s32.totalorder %s62_s19, %s2862_s26  ;;  %p2868_p1 = scmp.lt.s32.totalorder %s2862_s26, %s2862_s26 }
  0x40   :  { %p2869_p2 = por %p2868_p1, %p2867_p0 }
  0x42   :  { %p2870_p3 = pnand %p2869_p2, %p2863_p13 }
  0x44   :  { %2873 = shalt.err (!%p2870_p3)
}
  0x45   :  { %s2914_s3 = smov 64   ;;  %s2915_s27 = smov 4  }
  0x46   :  { %67 = dma.hbm_to_vmem [thread:$0]  %s3097_s5, 2048, %s62_s19, [#allocation9], %s2914_s3, %s2914_s3, %s2915_s27  }
  0x47   :  { %2896 = dma.done.wait [#allocation3], 1792  }
  0x48   :  { %2897 = vsyncadd [#allocation3], 4294965504 }
  0x49   :  { %2898 = dma.done.wait [#allocation6], 24960  }
  0x4a   :  { %2899 = vsyncadd [#allocation6], 4294942336 }
  0x4b   :  { %2900 = dma.done.wait [#allocation9], 2048  }
  0x4c   :  { %2901 = vsyncadd [#allocation9], 4294965248  ;;  %v2916_v0 = vmov 0   ;;  %v2454_v1 = vld [vmem:[#allocation5 + $0x4] ss:$12 sps:$4 sm:$0xff]   ;;  %v96_v19 = vld [vmem:[#allocation2 + $0x68] sm:$0xff] }
  0x4d   :  { %1266 = vmatprep.mubr.bf16.mxu1 %v2916_v0  ;;  %v2456_v2 = vld [vmem:[#allocation5] ss:$12 sps:$4 sm:$0xff]   ;;  %1105 = vmatprep.subr.bf16.mxu0 %v2454_v1  ;;  %v2457_v3 = vld [vmem:[#allocation5 + $0x1c] ss:$12 sps:$4 sm:$0xff]   ;;  %v2459_v4 = vld [vmem:[#allocation5 + $0x18] ss:$12 sps:$4 sm:$0xff]  }
  0x4e   :  { %1106 = vmatpush1.bf16.msra.mxu0 %v2456_v2  ;;  %v2460_v5 = vld [vmem:[#allocation5 + $0x34] ss:$12 sps:$4 sm:$0xff]   ;;  %v2462_v6 = vld [vmem:[#allocation5 + $0x30] ss:$12 sps:$4 sm:$0xff]   ;;  %v2463_v7 = vld [vmem:[#allocation5 + $0x4c] ss:$12 sps:$4 sm:$0xff]  }
  0x4f   :  { %1107 = vmatprep.subr.bf16.mxu0 %v2457_v3  ;;  %v2465_v8 = vld [vmem:[#allocation5 + $0x48] ss:$12 sps:$4 sm:$0xff]   ;;  %v2466_v9 = vld [vmem:[#allocation5 + $0x64] ss:$12 sps:$4 sm:$0xff]   ;;  %v2468_v10 = vld [vmem:[#allocation5 + $0x60] ss:$12 sps:$4 sm:$0xff]  }
  0x50   :  { %v2469_v11 = vld [vmem:[#allocation5 + $0x7c] ss:$12 sps:$4 sm:$0xff]   ;;  %v2471_v12 = vld [vmem:[#allocation5 + $0x78] ss:$12 sps:$4 sm:$0xff]   ;;  %v2498_v14 = vld [vmem:[#allocation5 + $0x480] ss:$12 sps:$4 sm:$0xff]  }
  0x51   :  { %v2496_v13 = vld [vmem:[#allocation5 + $0x484] ss:$12 sps:$4 sm:$0xff]   ;;  %v2472_v15 = vld [vmem:[#allocation5 + $0x94] ss:$12 sps:$4 sm:$0xff]   ;;  %vm1101_vm0 = vcmask 130048   ;;  %v84_v26 = vld [vmem:[#allocation2 + $0x8] sm:$0xff] }
  0x52   :  { %1108 = vmatpush1.bf16.msra.mxu0 %v2459_v4  ;;  %v2474_v16 = vld [vmem:[#allocation5 + $0x90] ss:$12 sps:$4 sm:$0xff]   ;;  %1234 = vmatprep.subr.bf16.mxu1 %v2496_v13  ;;  %v2502_v17 = vld [vmem:[#allocation5 + $0xc8] ss:$12 sps:$4 sm:$0xff]   ;;  %v89_v18 = vld [vmem:[#allocation2 + $0x30] sm:$0xff]  ;;  %vm2918_vm1 = vmmov 0  }
  0x53   :  { %1109 = vmatprep.subr.bf16.mxu0 %v2460_v5  ;;  %1235 = vmatpush1.bf16.msra.mxu1 %v2498_v14  ;;  %v3012_v20 = vpack.c.bf16 %v96_v19, %v89_v18  ;;  %v2503_v21 = vld [vmem:[#allocation5 + $0x8] ss:$12 sps:$4 sm:$0xff]   ;;  %v2475_v22 = vld [vmem:[#allocation5 + $0xac] ss:$12 sps:$4 sm:$0xff]   ;;  %v2478_v28 = vld [vmem:[#allocation5 + $0xc4] ss:$12 sps:$4 sm:$0xff]  }
  0x54   :  { %2318 = vmatprep.subr.bf16.mxu1 %v2502_v17  ;;  %v2477_v23 = vld [vmem:[#allocation5 + $0xa8] ss:$12 sps:$4 sm:$0xff]   ;;  %v2507_v24 = vld [vmem:[#allocation5 + $0xe0] ss:$12 sps:$4 sm:$0xff]   ;;  %v2512_v31 = vld [vmem:[#allocation5 + $0xf8] ss:$12 sps:$4 sm:$0xff]  }
  0x55   :  { %v2508_v25 = vld [vmem:[#allocation5 + $0x20] ss:$12 sps:$4 sm:$0xff]   ;;  %v91_v27 = vld [vmem:[#allocation2 + $0x40] sm:$0xff]  ;;  %v2513_v32 = vld [vmem:[#allocation5 + $0x38] ss:$12 sps:$4 sm:$0xff]  }
  0x56   :  { %1110 = vmatpush1.bf16.msra.mxu0 %v2462_v6  ;;  %2251 = vmatmul.mubr.msk.bf16.vlgmr.msra.gmra.mrb[0].mxu1 %vm1101_vm0, %v3012_v20  ;;  %v98_v29 = vpack.c.bf16 %v91_v27, %v84_v26  ;;  %v2480_v30 = vld [vmem:[#allocation5 + $0xc0] ss:$12 sps:$4 sm:$0xff]   ;;  %v2481_v33 = vld [vmem:[#allocation5 + $0xdc] ss:$12 sps:$4 sm:$0xff]   ;;  %v2483_v34 = vld [vmem:[#allocation5 + $0xd8] ss:$12 sps:$4 sm:$0xff]  }
  0x57   :  { %1111 = vmatprep.subr.bf16.mxu0 %v2463_v7  ;;  %2319 = vmatpush3.bf16.msra.mxu1 %v2503_v21  ;;  %v2517_v35 = vld [vmem:[#allocation5 + $0x110] ss:$12 sps:$4 sm:$0xff]   ;;  %v2484_v37 = vld [vmem:[#allocation5 + $0xf4] ss:$12 sps:$4 sm:$0xff]   ;;  %v2487_v41 = vld [vmem:[#allocation5 + $0x10c] ss:$12 sps:$4 sm:$0xff]  }
  0x58   :  { %2320 = vmatprep.subr.bf16.mxu1 %v2507_v24  ;;  %1137 = vmatprep.mubr.bf16.mxu0 %v98_v29  ;;  %v2518_v36 = vld [vmem:[#allocation5 + $0x50] ss:$12 sps:$4 sm:$0xff]   ;;  %v2522_v38 = vld [vmem:[#allocation5 + $0x128] ss:$12 sps:$4 sm:$0xff]   ;;  %v2527_v42 = vld [vmem:[#allocation5 + $0x140] ss:$12 sps:$4 sm:$0xff]  }
  0x59   :  { %1309 = vmatprep.mubr.bf16.mxu1 %v98_v29  ;;  %v2523_v39 = vld [vmem:[#allocation5 + $0x68] ss:$12 sps:$4 sm:$0xff]   ;;  %v2486_v40 = vld [vmem:[#allocation5 + $0xf0] ss:$12 sps:$4 sm:$0xff]   ;;  %v2528_v44 = vld [vmem:[#allocation5 + $0x80] ss:$12 sps:$4 sm:$0xff]  }
  0x5a   :  { %1112 = vmatpush1.bf16.msra.mxu0 %v2465_v8  ;;  %v2489_v43 = vld [vmem:[#allocation5 + $0x108] ss:$12 sps:$4 sm:$0xff]   ;;  %v2490_v45 = vld [vmem:[#allocation5 + $0x124] ss:$12 sps:$4 sm:$0xff]   ;;  %v2492_v47 = vld [vmem:[#allocation5 + $0x120] ss:$12 sps:$4 sm:$0xff]  }
  0x5b   :  { %1113 = vmatprep.subr.bf16.mxu0 %v2466_v9  ;;  %2321 = vmatpush3.bf16.msra.mxu1 %v2508_v25  ;;  %v2532_v46 = vld [vmem:[#allocation5 + $0x158] ss:$12 sps:$4 sm:$0xff]   ;;  %v2537_v49 = vld [vmem:[#allocation5 + $0x170] ss:$12 sps:$4 sm:$0xff]   ;;  %v2499_v52 = vld [vmem:[#allocation5 + $0x154] ss:$12 sps:$4 sm:$0xff]  }
  0x5c   :  { %2322 = vmatprep.subr.bf16.mxu1 %v2512_v31  ;;  %v2533_v48 = vld [vmem:[#allocation5 + $0x98] ss:$12 sps:$4 sm:$0xff]   ;;  %v2493_v50 = vld [vmem:[#allocation5 + $0x13c] ss:$12 sps:$4 sm:$0xff]   ;;  %v83_v53 = vld [vmem:[#allocation2] sm:$0xff] }
  0x5d   :  { %v2495_v51 = vld [vmem:[#allocation5 + $0x138] ss:$12 sps:$4 sm:$0xff]   ;;  %v2538_v54 = vld [vmem:[#allocation5 + $0xb0] ss:$12 sps:$4 sm:$0xff]   ;;  %v2542_v55 = vld [vmem:[#allocation5 + $0x248] ss:$12 sps:$4 sm:$0xff]  }
  0x5e   :  { %1114 = vmatpush1.bf16.msra.mxu0 %v2468_v10  ;;  %v90_v56 = vld [vmem:[#allocation2 + $0x38] sm:$0xff]  ;;  %v2501_v57 = vld [vmem:[#allocation5 + $0x150] ss:$12 sps:$4 sm:$0xff]   ;;  %v2552_v1 = vld [vmem:[#allocation5 + $0x278] ss:$12 sps:$4 sm:$0xff]  }
  0x5f   :  { %1115 = vmatprep.subr.bf16.mxu0 %v2469_v11  ;;  %2323 = vmatpush3.bf16.msra.mxu1 %v2513_v32  ;;  %v2543_v58 = vld [vmem:[#allocation5 + $0x188] ss:$12 sps:$4 sm:$0xff]   ;;  %v97_v59 = vpack.c.bf16 %v90_v56, %v83_v53  ;;  %v2547_v60 = vld [vmem:[#allocation5 + $0x260] ss:$12 sps:$4 sm:$0xff]   ;;  %v2511_v2 = vld [vmem:[#allocation5 + $0x184] ss:$12 sps:$4 sm:$0xff]  }
  0x60   :  { %2324 = vmatprep.subr.bf16.mxu1 %v2517_v35  ;;  %v2504_v61 = vld [vmem:[#allocation5 + $0x16c] ss:$12 sps:$4 sm:$0xff]   ;;  %v2506_v63 = vld [vmem:[#allocation5 + $0x168] ss:$12 sps:$4 sm:$0xff]   ;;  %v2557_v5 = vld [vmem:[#allocation5 + $0x290] ss:$12 sps:$4 sm:$0xff]  }
  0x61   :  { %v2548_v62 = vld [vmem:[#allocation5 + $0x1a0] ss:$12 sps:$4 sm:$0xff]   ;;  %v2553_v4 = vld [vmem:[#allocation5 + $0x1b8] ss:$12 sps:$4 sm:$0xff]   ;;  %v2516_v6 = vld [vmem:[#allocation5 + $0x19c] ss:$12 sps:$4 sm:$0xff]  }
  0x62   :  { %1116 = vmatpush1.bf16.msra.mxu0 %v2471_v12  ;;  %v2509_v3 = vld [vmem:[#allocation5 + $0x180] ss:$12 sps:$4 sm:$0xff]   ;;  %v2514_v7 = vld [vmem:[#allocation5 + $0x198] ss:$12 sps:$4 sm:$0xff]   ;;  %v2558_v8 = vld [vmem:[#allocation5 + $0x1d0] ss:$12 sps:$4 sm:$0xff]  }
  0x63   :  { %1117 = vmatprep.subr.bf16.mxu0 %v2472_v15  ;;  %2325 = vmatpush3.bf16.msra.mxu1 %v2518_v36  ;;  %v2562_v9 = vld [vmem:[#allocation5 + $0x2a8] ss:$12 sps:$4 sm:$0xff]   ;;  %v2519_v11 = vld [vmem:[#allocation5 + $0x1b0] ss:$12 sps:$4 sm:$0xff]   ;;  %v2567_v13 = vld [vmem:[#allocation5 + $0x2c0] ss:$12 sps:$4 sm:$0xff]  }
  0x64   :  { %2326 = vmatprep.subr.bf16.mxu1 %v2522_v38  ;;  %v2521_v10 = vld [vmem:[#allocation5 + $0x1b4] ss:$12 sps:$4 sm:$0xff]   ;;  %v2526_v14 = vld [vmem:[#allocation5 + $0x1cc] ss:$12 sps:$4 sm:$0xff]   ;;  %v2531_v18 = vld [vmem:[#allocation5 + $0x1e4] ss:$12 sps:$4 sm:$0xff]  }
  0x65   :  { %v2563_v12 = vld [vmem:[#allocation5 + $0x1e8] ss:$12 sps:$4 sm:$0xff]   ;;  %v2572_v17 = vld [vmem:[#allocation5 + $0x2d8] ss:$12 sps:$4 sm:$0xff]   ;;  %v2577_v26 = vld [vmem:[#allocation5 + $0x2f0] ss:$12 sps:$4 sm:$0xff]  }
  0x66   :  { %1118 = vmatpush1.bf16.msra.mxu0 %v2474_v16  ;;  %v2524_v15 = vld [vmem:[#allocation5 + $0x1c8] ss:$12 sps:$4 sm:$0xff]   ;;  %v2568_v16 = vld [vmem:[#allocation5 + $0x200] ss:$12 sps:$4 sm:$0xff]   ;;  %v2573_v24 = vld [vmem:[#allocation5 + $0x218] ss:$12 sps:$4 sm:$0xff]  }
  0x67   :  { %1119 = vmatprep.subr.bf16.mxu0 %v2475_v22  ;;  %2327 = vmatpush3.bf16.msra.mxu1 %v2523_v39  ;;  %v86_v19 = vld [vmem:[#allocation2 + $0x18] sm:$0xff]  ;;  %v93_v21 = vld [vmem:[#allocation2 + $0x50] sm:$0xff]  ;;  %v2578_v27 = vld [vmem:[#allocation5 + $0x230] ss:$12 sps:$4 sm:$0xff]  }
  0x68   :  { %2328 = vmatprep.subr.bf16.mxu1 %v2527_v42  ;;  %v2529_v22 = vld [vmem:[#allocation5 + $0x1e0] ss:$12 sps:$4 sm:$0xff]   ;;  %v100_v25 = vpack.c.bf16 %v93_v21, %v86_v19  ;;  %v2582_v31 = vld [vmem:[#allocation5 + $0x3c8] ss:$12 sps:$4 sm:$0xff]   ;;  %v2539_v35 = vld [vmem:[#allocation5 + $0x210] ss:$12 sps:$4 sm:$0xff]  }
  0x69   :  { %v85_v29 = vld [vmem:[#allocation2 + $0x10] sm:$0xff]  ;;  %v2544_v38 = vld [vmem:[#allocation5 + $0x228] ss:$12 sps:$4 sm:$0xff]   ;;  %v2566_v53 = vld [vmem:[#allocation5 + $0x28c] ss:$12 sps:$4 sm:$0xff]  }
  0x6a   :  { %1120 = vmatpush1.bf16.msra.mxu0 %v2477_v23  ;;  %v2536_v23 = vld [vmem:[#allocation5 + $0x1fc] ss:$12 sps:$4 sm:$0xff]   ;;  %v2541_v32 = vld [vmem:[#allocation5 + $0x214] ss:$12 sps:$4 sm:$0xff]   ;;  %v2606_v19 = vld [vmem:[#allocation5 + $0x34c] ss:$12 sps:$4 sm:$0xff]  }
  0x6b   :  { %1121 = vmatprep.subr.bf16.mxu0 %v2478_v28  ;;  %2329 = vmatpush3.bf16.msra.mxu1 %v2528_v44  ;;  %v2534_v28 = vld [vmem:[#allocation5 + $0x1f8] ss:$12 sps:$4 sm:$0xff]   ;;  %v2587_v36 = vld [vmem:[#allocation5 + $0x3e0] ss:$12 sps:$4 sm:$0xff]   ;;  %v2597_v44 = vld [vmem:[#allocation5 + $0x410] ss:$12 sps:$4 sm:$0xff]  }
  0x6c   :  { %2330 = vmatprep.subr.bf16.mxu1 %v2532_v46  ;;  %v2588_v39 = vld [vmem:[#allocation5 + $0x320] ss:$12 sps:$4 sm:$0xff]   ;;  %v2554_v46 = vld [vmem:[#allocation5 + $0x258] ss:$12 sps:$4 sm:$0xff]   ;;  %v95_v56 = vld [vmem:[#allocation2 + $0x60] sm:$0xff] }
  0x6d   :  { %v2549_v42 = vld [vmem:[#allocation5 + $0x240] ss:$12 sps:$4 sm:$0xff]   ;;  %v2604_v21 = vld [vmem:[#allocation5 + $0x348] ss:$12 sps:$4 sm:$0xff]  }
  0x6e   :  { %1122 = vmatpush1.bf16.msra.mxu0 %v2480_v30  ;;  %v92_v30 = vld [vmem:[#allocation2 + $0x48] sm:$0xff] }
  0x6f   :  { %1123 = vmatprep.subr.bf16.mxu0 %v2481_v33  ;;  %2331 = vmatpush3.bf16.msra.mxu1 %v2533_v48  ;;  %v3016_v33 = vpack.c.bf16 %v92_v30, %v85_v29  ;;  %v2602_v48 = vld [vmem:[#allocation5 + $0x428] ss:$12 sps:$4 sm:$0xff]   ;;  %v2628_v29 = vld [vmem:[#allocation5 + $0x3c4] ss:$12 sps:$4 sm:$0xff]   ;;  %v2626_v30 = vld [vmem:[#allocation5 + $0x3c0] ss:$12 sps:$4 sm:$0xff]  }
  0x70   :  { %2332 = vmatprep.subr.bf16.mxu1 %v2537_v49  ;;  %v2561_v49 = vld [vmem:[#allocation5 + $0x274] ss:$12 sps:$4 sm:$0xff]  }
  0x72   :  { %1124 = vmatpush1.bf16.msra.mxu0 %v2483_v34  ;;  %v2583_v34 = vld [vmem:[#allocation5 + $0x308] ss:$12 sps:$4 sm:$0xff]  }
  0x73   :  { %1125 = vmatprep.subr.bf16.mxu0 %v2484_v37  ;;  %2333 = vmatpush3.bf16.msra.mxu1 %v2538_v54  ;;  %v2546_v37 = vld [vmem:[#allocation5 + $0x22c] ss:$12 sps:$4 sm:$0xff]  }
  0x74   :  { %2340 = vmatprep.subr.bf16.mxu1 %v2542_v55  ;;  %v88_v54 = vld [vmem:[#allocation2 + $0x28] sm:$0xff]  ;;  %v2564_v55 = vld [vmem:[#allocation5 + $0x288] ss:$12 sps:$4 sm:$0xff]  }
  0x76   :  { %1126 = vmatpush1.bf16.msra.mxu0 %v2486_v40  ;;  %1310 = vmatmul.mubr.bf16.vlgmr.msra.gmra.mrb[4].mxu1 %v97_v59  ;;  %v2592_v40 = vld [vmem:[#allocation5 + $0x3f8] ss:$12 sps:$4 sm:$0xff]  }
  0x77   :  { %1127 = vmatprep.subr.bf16.mxu0 %v2487_v41  ;;  %2341 = vmatpush3.bf16.msra.mxu1 %v2543_v58  ;;  %v2551_v41 = vld [vmem:[#allocation5 + $0x244] ss:$12 sps:$4 sm:$0xff]   ;;  %v102_v58 = vpack.c.bf16 %v95_v56, %v88_v54  ;;  %v2656_v54 = vld [vmem:[#allocation7 + $0x20] ss:$8 sps:$4 sm:$0xff]  }
  0x78   :  { %2342 = vmatprep.subr.bf16.mxu1 %v2547_v60  ;;  %1350 = vmatprep.mubr.bf16.mxu1 %v100_v25  ;;  %v2571_v60 = vld [vmem:[#allocation5 + $0x2a4] ss:$12 sps:$4 sm:$0xff]  }
  0x79   :  { %v2659_v56 = vld [vmem:[#allocation7 + $0x30] ss:$8 sps:$4 sm:$0xff]  }
  0x7a   :  { %1128 = vmatpush1.bf16.msra.mxu0 %v2489_v43  ;;  %v2593_v43 = vld [vmem:[#allocation5 + $0x338] ss:$12 sps:$4 sm:$0xff]  }
  0x7b   :  { %1129 = vmatprep.subr.bf16.mxu0 %v2490_v45  ;;  %2343 = vmatpush3.bf16.msra.mxu1 %v2548_v62  ;;  %v2556_v45 = vld [vmem:[#allocation5 + $0x25c] ss:$12 sps:$4 sm:$0xff]   ;;  %v2613_v62 = vld [vmem:[#allocation5 + $0x398] ss:$12 sps:$4 sm:$0xff]  }
  0x7c   :  { %2344 = vmatprep.subr.bf16.mxu1 %v2552_v1  ;;  %v2576_v1 = vld [vmem:[#allocation5 + $0x2bc] ss:$12 sps:$4 sm:$0xff]  }
  0x7e   :  { %1130 = vmatpush1.bf16.msra.mxu0 %v2492_v47  ;;  %v2598_v47 = vld [vmem:[#allocation5 + $0x350] ss:$12 sps:$4 sm:$0xff]  }
  0x7f   :  { %1131 = vmatprep.subr.bf16.mxu0 %v2493_v50  ;;  %2345 = vmatpush3.bf16.msra.mxu1 %v2553_v4  ;;  %v2559_v50 = vld [vmem:[#allocation5 + $0x270] ss:$12 sps:$4 sm:$0xff]   ;;  %v94_v4 = vld [vmem:[#allocation2 + $0x58] sm:$0xff] }
  0x80   :  { %2346 = vmatprep.subr.bf16.mxu1 %v2557_v5  ;;  %v2574_v5 = vld [vmem:[#allocation5 + $0x2b8] ss:$12 sps:$4 sm:$0xff]  }
  0x82   :  { %1132 = vmatpush1.bf16.msra.mxu0 %v2495_v51  ;;  %v2603_v51 = vld [vmem:[#allocation5 + $0x368] ss:$12 sps:$4 sm:$0xff]  }
  0x83   :  { %1133 = vmatprep.subr.bf16.mxu0 %v2499_v52  ;;  %2347 = vmatpush3.bf16.msra.mxu1 %v2558_v8  ;;  %v2607_v52 = vld [vmem:[#allocation5 + $0x440] ss:$12 sps:$4 sm:$0xff]  }
  0x84   :  { %2348 = vmatprep.subr.bf16.mxu1 %v2562_v9  ;;  %v2586_v9 = vld [vmem:[#allocation5 + $0x2ec] ss:$12 sps:$4 sm:$0xff]  }
  0x86   :  { %1134 = vmatpush1.bf16.msra.mxu0 %v2501_v57  ;;  %v2608_v57 = vld [vmem:[#allocation5 + $0x380] ss:$12 sps:$4 sm:$0xff]  }
  0x87   :  { %1135 = vmatprep.subr.bf16.mxu0 %v2504_v61  ;;  %2349 = vmatpush3.bf16.msra.mxu1 %v2563_v12  ;;  %v2569_v61 = vld [vmem:[#allocation5 + $0x2a0] ss:$12 sps:$4 sm:$0xff]   ;;  %v2584_v12 = vld [vmem:[#allocation5 + $0x2e8] ss:$12 sps:$4 sm:$0xff]  }
  0x88   :  { %2350 = vmatprep.subr.bf16.mxu1 %v2567_v13  ;;  %v2591_v13 = vld [vmem:[#allocation5 + $0x304] ss:$12 sps:$4 sm:$0xff]  }
  0x8a   :  { %1136 = vmatpush1.bf16.msra.mxu0 %v2506_v63  ;;  %v2617_v63 = vld [vmem:[#allocation5 + $0x470] ss:$12 sps:$4 sm:$0xff]  }
  0x8b   :  { %1148 = vmatprep.subr.bf16.mxu0 %v2511_v2  ;;  %2351 = vmatpush3.bf16.msra.mxu1 %v2568_v16  ;;  %v2618_v2 = vld [vmem:[#allocation5 + $0x3b0] ss:$12 sps:$4 sm:$0xff]   ;;  %v2594_v16 = vld [vmem:[#allocation5 + $0x318] ss:$12 sps:$4 sm:$0xff]  }
  0x8c   :  { %2352 = vmatprep.subr.bf16.mxu1 %v2572_v17  ;;  %v2601_v17 = vld [vmem:[#allocation5 + $0x334] ss:$12 sps:$4 sm:$0xff]  }
  0x8d   :  { %1138 = vmatmul.mubr.bf16.vlgmr.msra.gmra.mrb[0].mxu0 %v97_v59  ;;  %v2612_v59 = vld [vmem:[#allocation5 + $0x458] ss:$12 sps:$4 sm:$0xff]  }
  0x8e   :  { %1149 = vmatpush1.bf16.msra.mxu0 %v2509_v3  ;;  %1180 = vmatprep.mubr.bf16.mxu0 %v100_v25  ;;  %v87_v3 = vld [vmem:[#allocation2 + $0x20] sm:$0xff] }
  0x8f   :  { %1150 = vmatprep.subr.bf16.mxu0 %v2516_v6  ;;  %2353 = vmatpush3.bf16.msra.mxu1 %v2573_v24  ;;  %v2581_v6 = vld [vmem:[#allocation5 + $0x2d4] ss:$12 sps:$4 sm:$0xff]   ;;  %v3019_v8 = vpack.c.bf16 %v94_v4, %v87_v3  ;;  %v2616_v24 = vld [vmem:[#allocation5 + $0x37c] ss:$12 sps:$4 sm:$0xff]  }
  0x90   :  { %2354 = vmatprep.subr.bf16.mxu1 %v2577_v26  ;;  %v2621_v25 = vld [vmem:[#allocation5 + $0x394] ss:$12 sps:$4 sm:$0xff]   ;;  %v2619_v26 = vld [vmem:[#allocation5 + $0x390] ss:$12 sps:$4 sm:$0xff]  }
  0x92   :  { %1151 = vmatpush1.bf16.msra.mxu0 %v2514_v7  ;;  %v2579_v7 = vld [vmem:[#allocation5 + $0x2d0] ss:$12 sps:$4 sm:$0xff]  }
  0x93   :  { %1152 = vmatprep.subr.bf16.mxu0 %v2521_v10  ;;  %2355 = vmatpush3.bf16.msra.mxu1 %v2578_v27  ;;  %v2625_v10 = vld [vmem:[#allocation5 + $0x488] ss:$12 sps:$4 sm:$0xff]   ;;  %v2624_v27 = vld [vmem:[#allocation5 + $0x3ac] ss:$12 sps:$4 sm:$0xff]  }
  0x94   :  { %2362 = vmatprep.subr.bf16.mxu1 %v2582_v31  ;;  %v2631_v31 = vld [vmem:[#allocation5 + $0x3dc] ss:$12 sps:$4 sm:$0xff]  }
  0x96   :  { %1153 = vmatpush1.bf16.msra.mxu0 %v2519_v11  ;;  %1351 = vmatmul.mubr.bf16.vlgmr.msra.gmra.mrb[8].mxu1 %v3016_v33  ;;  %v2917_v11 = vmov 0.0  }
  0x97   :  { %1154 = vmatprep.subr.bf16.mxu0 %v2526_v14  ;;  %2363 = vmatpush3.bf16.msra.mxu1 %v2583_v34  ;;  %v2589_v14 = vld [vmem:[#allocation5 + $0x300] ss:$12 sps:$4 sm:$0xff]   ;;  %v2632_v34 = vld [vmem:[#allocation5 + $0x3f0] ss:$12 sps:$4 sm:$0xff]  }
  0x98   :  { %2364 = vmatprep.subr.bf16.mxu1 %v2587_v36  ;;  %1391 = vmatprep.mubr.bf16.mxu1 %v102_v58  ;;  %v2635_v36 = vld [vmem:[#allocation5 + $0x408] ss:$12 sps:$4 sm:$0xff]  }
  0x9a   :  { %1155 = vmatpush1.bf16.msra.mxu0 %v2524_v15  ;;  %v2596_v15 = vld [vmem:[#allocation5 + $0x31c] ss:$12 sps:$4 sm:$0xff]  }
  0x9b   :  { %1156 = vmatprep.subr.bf16.mxu0 %v2531_v18  ;;  %2365 = vmatpush3.bf16.msra.mxu1 %v2588_v39  ;;  %v2599_v18 = vld [vmem:[#allocation5 + $0x330] ss:$12 sps:$4 sm:$0xff]  }
  0x9c   :  { %2366 = vmatprep.subr.bf16.mxu1 %v2592_v40  ;;  %v2643_v39 = vld [vmem:[#allocation5 + $0x43c] ss:$12 sps:$4 sm:$0xff]   ;;  %v2641_v40 = vld [vmem:[#allocation5 + $0x438] ss:$12 sps:$4 sm:$0xff]  }
  0x9e   :  { %1157 = vmatpush1.bf16.msra.mxu0 %v2529_v22  ;;  %v2611_v22 = vld [vmem:[#allocation5 + $0x364] ss:$12 sps:$4 sm:$0xff]  }
  0x9f   :  { %1158 = vmatprep.subr.bf16.mxu0 %v2536_v23  ;;  %2367 = vmatpush3.bf16.msra.mxu1 %v2593_v43  ;;  %v2609_v23 = vld [vmem:[#allocation5 + $0x360] ss:$12 sps:$4 sm:$0xff]  }
  0xa0   :  { %2368 = vmatprep.subr.bf16.mxu1 %v2597_v44  ;;  %v2649_v43 = vld [vmem:[#allocation5 + $0x46c] ss:$12 sps:$4 sm:$0xff]   ;;  %v2647_v44 = vld [vmem:[#allocation5 + $0x468] ss:$12 sps:$4 sm:$0xff]  }
  0xa2   :  { %1159 = vmatpush1.bf16.msra.mxu0 %v2534_v28  ;;  %v2622_v28 = vld [vmem:[#allocation5 + $0x3a8] ss:$12 sps:$4 sm:$0xff]  }
  0xa3   :  { %1160 = vmatprep.subr.bf16.mxu0 %v2541_v32  ;;  %2369 = vmatpush3.bf16.msra.mxu1 %v2598_v47  ;;  %v2629_v32 = vld [vmem:[#allocation5 + $0x3d8] ss:$12 sps:$4 sm:$0xff]   ;;  %v2655_v47 = vld [vmem:[#allocation7 + $0x14] ss:$8 sps:$4 sm:$0xff]  }
  0xa4   :  { %2370 = vmatprep.subr.bf16.mxu1 %v2602_v48 }
  0xa6   :  { %1161 = vmatpush1.bf16.msra.mxu0 %v2539_v35  ;;  %v2637_v35 = vld [vmem:[#allocation5 + $0x40c] ss:$12 sps:$4 sm:$0xff]  }
  0xa7   :  { %1162 = vmatprep.subr.bf16.mxu0 %v2546_v37  ;;  %2371 = vmatpush3.bf16.msra.mxu1 %v2603_v51  ;;  %v2640_v37 = vld [vmem:[#allocation5 + $0x424] ss:$12 sps:$4 sm:$0xff]  }
  0xa8   :  { %2372 = vmatprep.subr.bf16.mxu1 %v2607_v52  ;;  %v2658_v52 = vld [vmem:[#allocation7 + $0x24] ss:$8 sps:$4 sm:$0xff]  }
  0xaa   :  { %1163 = vmatpush1.bf16.msra.mxu0 %v2544_v38  ;;  %v2638_v38 = vld [vmem:[#allocation5 + $0x420] ss:$12 sps:$4 sm:$0xff]  }
  0xab   :  { %1164 = vmatprep.subr.bf16.mxu0 %v2551_v41  ;;  %2373 = vmatpush3.bf16.msra.mxu1 %v2608_v57  ;;  %v2646_v41 = vld [vmem:[#allocation5 + $0x454] ss:$12 sps:$4 sm:$0xff]   ;;  %v2664_v57 = vld [vmem:[#allocation7 + $0x44] ss:$8 sps:$4 sm:$0xff]  }
  0xac   :  { %2374 = vmatprep.subr.bf16.mxu1 %v2612_v59  ;;  %v2667_v59 = vld [vmem:[#allocation7 + $0x54] ss:$8 sps:$4 sm:$0xff]  }
  0xae   :  { %1165 = vmatpush1.bf16.msra.mxu0 %v2549_v42  ;;  %v2644_v42 = vld [vmem:[#allocation5 + $0x450] ss:$12 sps:$4 sm:$0xff]  }
  0xaf   :  { %1166 = vmatprep.subr.bf16.mxu0 %v2556_v45  ;;  %2375 = vmatpush3.bf16.msra.mxu1 %v2613_v62  ;;  %v2650_v45 = vld [vmem:[#allocation7] ss:$8 sps:$4 sm:$0xff]  }
  0xb0   :  { %2376 = vmatprep.subr.bf16.mxu1 %v2617_v63  ;;  %v2668_v62 = vld [vmem:[#allocation7 + $0x60] ss:$8 sps:$4 sm:$0xff]  }
  0xb2   :  { %1167 = vmatpush1.bf16.msra.mxu0 %v2554_v46  ;;  %v2652_v46 = vld [vmem:[#allocation7 + $0x4] ss:$8 sps:$4 sm:$0xff]  }
  0xb3   :  { %1168 = vmatprep.subr.bf16.mxu0 %v2561_v49  ;;  %2377 = vmatpush3.bf16.msra.mxu1 %v2618_v2 }
  0xb4   :  { %2408 = vmatprep.subr.bf16.mxu1 %v2917_v11 }
  0xb6   :  { %1169 = vmatpush1.bf16.msra.mxu0 %v2559_v50  ;;  %1392 = vmatmul.mubr.bf16.vlgmr.msra.gmra.mrb[12].mxu1 %v3019_v8  ;;  %v2653_v50 = vld [vmem:[#allocation7 + $0x10] ss:$8 sps:$4 sm:$0xff]  }
  0xb7   :  { %1170 = vmatprep.subr.bf16.mxu0 %v2566_v53  ;;  %2409 = vmatpush3.bf16.msra.mxu1 %v2625_v10  ;;  %v302_v10 = vlaneseq }
  0xb8   :  { %2410 = vmatprep.mubr.msk.bf16.mxu1 %vm2918_vm1, %v2917_v11  ;;  %1774 = vmatprep.subr.bf16.mxu1 %v2652_v46  ;;  %v2679_v11 = vld [vmem:[#allocation7 + $0x94] ss:$8 sps:$4 sm:$0xff]  }
  0xba   :  { %1171 = vmatpush1.bf16.msra.mxu0 %v2564_v55  ;;  %v2661_v55 = vld [vmem:[#allocation7 + $0x34] ss:$8 sps:$4 sm:$0xff]  }
  0xbb   :  { %1172 = vmatprep.subr.bf16.mxu0 %v2571_v60  ;;  %v2665_v60 = vld [vmem:[#allocation7 + $0x50] ss:$8 sps:$4 sm:$0xff]  }
  0xbe   :  { %1173 = vmatpush1.bf16.msra.mxu0 %v2569_v61  ;;  %2411 = vmatmul.mubr.msk.bf16.vlgmr.msra.gmra.mrb[16].mxu1 %vm1101_vm0, %v3012_v20  ;;  %v2614_v20 = vld [vmem:[#allocation5 + $0x378] ss:$12 sps:$4 sm:$0xff]  }
  0xbf   :  { %1174 = vmatprep.subr.bf16.mxu0 %v2576_v1  ;;  %1775 = vmatpush1.bf16.msra.mxu1 %v2650_v45  ;;  %v2670_v61 = vld [vmem:[#allocation7 + $0x64] ss:$8 sps:$4 sm:$0xff]  }
  0xc0   :  { %1776 = vmatprep.subr.bf16.mxu1 %v2655_v47 }
  0xc2   :  { %1175 = vmatpush1.bf16.msra.mxu0 %v2574_v5 }
  0xc3   :  { %1176 = vmatprep.subr.bf16.mxu0 %v2581_v6  ;;  %1777 = vmatpush1.bf16.msra.mxu1 %v2653_v50  ;;  %v2673_v6 = vld [vmem:[#allocation7 + $0x74] ss:$8 sps:$4 sm:$0xff]  }
  0xc4   :  { %1778 = vmatprep.subr.bf16.mxu1 %v2658_v52 }
  0xc6   :  { %1177 = vmatpush1.bf16.msra.mxu0 %v2579_v7  ;;  %v2671_v7 = vld [vmem:[#allocation7 + $0x70] ss:$8 sps:$4 sm:$0xff]  }
  0xc7   :  { %1178 = vmatprep.subr.bf16.mxu0 %v2586_v9  ;;  %1779 = vmatpush1.bf16.msra.mxu1 %v2656_v54  ;;  %v2674_v9 = vld [vmem:[#allocation7 + $0x80] ss:$8 sps:$4 sm:$0xff]  }
  0xc8   :  { %1780 = vmatprep.subr.bf16.mxu1 %v2661_v55 }
  0xca   :  { %1179 = vmatpush1.bf16.msra.mxu0 %v2584_v12  ;;  %v2677_v12 = vld [vmem:[#allocation7 + $0x90] ss:$8 sps:$4 sm:$0xff]  }
  0xcb   :  { %1191 = vmatprep.subr.bf16.mxu0 %v2591_v13  ;;  %1781 = vmatpush1.bf16.msra.mxu1 %v2659_v56  ;;  %v3035_v13 = vshrl.u32 %v302_v10, 7 }
  0xcc   :  { %1782 = vmatprep.subr.bf16.mxu1 %v2664_v57 }
  0xcd   :  { %1181 = vmatmul.mubr.bf16.vlgmr.msra.gmra.mrb[0].mxu0 %v3016_v33  ;;  %v2634_v33 = vld [vmem:[#allocation5 + $0x3f4] ss:$12 sps:$4 sm:$0xff]  }
  0xce   :  { %1192 = vmatpush1.bf16.msra.mxu0 %v2589_v14  ;;  %1223 = vmatprep.mubr.bf16.mxu0 %v102_v58  ;;  %v2662_v58 = vld [vmem:[#allocation7 + $0x40] ss:$8 sps:$4 sm:$0xff]   ;;  %v2682_v14 = vld [vmem:[#allocation7 + $0xa4] ss:$8 sps:$4 sm:$0xff]  }
  0xcf   :  { %1193 = vmatprep.subr.bf16.mxu0 %v2596_v15  ;;  %1783 = vmatpush1.bf16.msra.mxu1 %v2662_v58  ;;  %v2680_v15 = vld [vmem:[#allocation7 + $0xa0] ss:$8 sps:$4 sm:$0xff]  }
  0xd0   :  { %1784 = vmatprep.subr.bf16.mxu1 %v2667_v59 }
  0xd2   :  { %1194 = vmatpush1.bf16.msra.mxu0 %v2594_v16  ;;  %v312_v16 = vsub.s32 2, %v3035_v13 }
  0xd3   :  { %1195 = vmatprep.subr.bf16.mxu0 %v2601_v17  ;;  %1785 = vmatpush1.bf16.msra.mxu1 %v2665_v60  ;;  %v3041_v17 = vld [vmem:[%s3094_s2] sm:$0x7] }
  0xd4   :  { %1786 = vmatprep.subr.bf16.mxu1 %v2670_v61 }
  0xd6   :  { %1196 = vmatpush1.bf16.msra.mxu0 %v2599_v18  ;;  %v2685_v18 = vld [vmem:[#allocation7 + $0xb4] ss:$8 sps:$4 sm:$0xff]  }
  0xd7   :  { %1197 = vmatprep.subr.bf16.mxu0 %v2606_v19  ;;  %1787 = vmatpush1.bf16.msra.mxu1 %v2668_v62  ;;  %v2683_v19 = vld [vmem:[#allocation7 + $0xb0] ss:$8 sps:$4 sm:$0xff]  }
  0xd8   :  { %1788 = vmatprep.subr.bf16.mxu1 %v2673_v6  ;;  %v304_v6 = vsub.s32 0, %v3035_v13 }
  0xda   :  { %1198 = vmatpush1.bf16.msra.mxu0 %v2604_v21  ;;  %v313_v21 = vrot.slane %v3041_v17, %v312_v16 }
  0xdb   :  { %1199 = vmatprep.subr.bf16.mxu0 %v2611_v22  ;;  %1789 = vmatpush1.bf16.msra.mxu1 %v2671_v7  ;;  %v2688_v22 = vld [vmem:[#allocation7 + $0xc4] ss:$8 sps:$4 sm:$0xff]   ;;  %v308_v7 = vsub.s32 1, %v3035_v13 }
  0xde   :  { %1200 = vmatpush1.bf16.msra.mxu0 %v2609_v23  ;;  %v2686_v23 = vld [vmem:[#allocation7 + $0xc0] ss:$8 sps:$4 sm:$0xff]  }
  0xdf   :  { %1201 = vmatprep.subr.bf16.mxu0 %v2616_v24 }
  0xe2   :  { %1202 = vmatpush1.bf16.msra.mxu0 %v2614_v20 }
  0xe3   :  { %1203 = vmatprep.subr.bf16.mxu0 %v2621_v25 }
  0xe6   :  { %1204 = vmatpush1.bf16.msra.mxu0 %v2619_v26  ;;  %v2691_v26 = vld [vmem:[#allocation7 + $0xd4] ss:$8 sps:$4 sm:$0xff]  }
  0xe7   :  { %1205 = vmatprep.subr.bf16.mxu0 %v2624_v27 }
  0xea   :  { %1206 = vmatpush1.bf16.msra.mxu0 %v2622_v28 }
  0xeb   :  { %1207 = vmatprep.subr.bf16.mxu0 %v2628_v29 }
  0xee   :  { %1208 = vmatpush1.bf16.msra.mxu0 %v2626_v30  ;;  %v2689_v30 = vld [vmem:[#allocation7 + $0xd0] ss:$8 sps:$4 sm:$0xff]  }
  0xef   :  { %1209 = vmatprep.subr.bf16.mxu0 %v2631_v31 }
  0xf2   :  { %1210 = vmatpush1.bf16.msra.mxu0 %v2629_v32  ;;  %v2694_v32 = vld [vmem:[#allocation7 + $0xe4] ss:$8 sps:$4 sm:$0xff]  }
  0xf3   :  { %1211 = vmatprep.subr.bf16.mxu0 %v2634_v33 }
  0xf6   :  { %1212 = vmatpush1.bf16.msra.mxu0 %v2632_v34 }
  0xf7   :  { %1213 = vmatprep.subr.bf16.mxu0 %v2637_v35  ;;  %v2692_v35 = vld [vmem:[#allocation7 + $0xe0] ss:$8 sps:$4 sm:$0xff]  }
  0xfa   :  { %1214 = vmatpush1.bf16.msra.mxu0 %v2635_v36  ;;  %v2697_v36 = vld [vmem:[#allocation7 + $0xf4] ss:$8 sps:$4 sm:$0xff]  }
  0xfb   :  { %1215 = vmatprep.subr.bf16.mxu0 %v2640_v37 }
  0xfe   :  { %1216 = vmatpush1.bf16.msra.mxu0 %v2638_v38  ;;  %v2695_v38 = vld [vmem:[#allocation7 + $0xf0] ss:$8 sps:$4 sm:$0xff]  }
  0xff   :  { %1217 = vmatprep.subr.bf16.mxu0 %v2643_v39  ;;  %v2700_v39 = vld [vmem:[#allocation7 + $0x104] ss:$8 sps:$4 sm:$0xff]  }
 0x102   :  { %1218 = vmatpush1.bf16.msra.mxu0 %v2641_v40 }
 0x103   :  { %1219 = vmatprep.subr.bf16.mxu0 %v2646_v41 }
 0x106   :  { %1220 = vmatpush1.bf16.msra.mxu0 %v2644_v42 }
 0x107   :  { %1221 = vmatprep.subr.bf16.mxu0 %v2649_v43 }
 0x10a   :  { %1222 = vmatpush1.bf16.msra.mxu0 %v2647_v44 }
 0x10d   :  { %1224 = vmatmul.mubr.bf16.vlgmr.msra.gmra.mrb[0].mxu0 %v3019_v8  ;;  %v2676_v8 = vld [vmem:[#allocation7 + $0x84] ss:$8 sps:$4 sm:$0xff]  }
 0x10e   :  { %1790 = vmatprep.subr.bf16.mxu1 %v2676_v8  ;;  %v305_v8 = vrot.slane %v3041_v17, %v304_v6 }
 0x10f   :  { %1791 = vmatpush1.bf16.msra.mxu1 %v2674_v9  ;;  %v309_v9 = vrot.slane %v3041_v17, %v308_v7 }
 0x110   :  { %1792 = vmatprep.subr.bf16.mxu1 %v2679_v11 }
 0x113   :  { %1793 = vmatpush1.bf16.msra.mxu1 %v2677_v12 }
 0x114   :  { %1794 = vmatprep.subr.bf16.mxu1 %v2682_v14 }
 0x117   :  { %1795 = vmatpush1.bf16.msra.mxu1 %v2680_v15 }
 0x118   :  { %1796 = vmatprep.subr.bf16.mxu1 %v2685_v18 }
 0x11b   :  { %1797 = vmatpush1.bf16.msra.mxu1 %v2683_v19 }
 0x11c   :  { %1798 = vmatprep.subr.bf16.mxu1 %v2688_v22 }
 0x11f   :  { %1799 = vmatpush1.bf16.msra.mxu1 %v2686_v23 }
 0x120   :  { %1800 = vmatprep.subr.bf16.mxu1 %v2691_v26 }
 0x123   :  { %1801 = vmatpush1.bf16.msra.mxu1 %v2689_v30 }
 0x124   :  { %1802 = vmatprep.subr.bf16.mxu1 %v2694_v32 }
 0x127   :  { %1803 = vmatpush1.bf16.msra.mxu1 %v2692_v35 }
 0x128   :  { %1804 = vmatprep.subr.bf16.mxu1 %v2697_v36 }
 0x129   :  { %v3026_v48 = vpop.f32.mrb[0].mxu1 }
 0x12a   :  { %v3028_v49 = vpop.f32.mrb[1].mxu1 }
 0x12b   :  { %v3030_v51 = vpop.f32.mrb[2].mxu1  ;;  %1805 = vmatpush1.bf16.msra.mxu1 %v2695_v38 }
 0x12c   :  { %v3032_v53 = vpop.f32.mrb[3].mxu1  ;;  %1817 = vmatprep.subr.bf16.mxu1 %v2700_v39 }
 0x149   :  { %v2334_v63 = vpop.f32.mrb[4].mxu1 }
 0x14a   :  { %v2335_v1 = vpop.f32.mrb[5].mxu1 }
 0x14b   :  { %v2336_v2 = vadd.f32 %v2335_v1, %v2334_v63  ;;  %v2337_v3 = vpop.f32.mrb[6].mxu1 }
 0x14c   :  { %v2338_v4 = vpop.f32.mrb[7].mxu1 }
 0x14d   :  { %v2339_v5 = vadd.f32 %v2338_v4, %v2337_v3  ;;  %v1312_v24 = vadd.f32 %v2336_v2, %v313_v21 }
 0x14f   :  { %v1315_v27 = vadd.f32 %v2339_v5, %v313_v21 }
 0x169   :  { %v2356_v20 = vpop.f32.mrb[8].mxu1 }
 0x16a   :  { %v2357_v25 = vpop.f32.mrb[9].mxu1 }
 0x16b   :  { %v2358_v28 = vadd.f32 %v2357_v25, %v2356_v20  ;;  %v2359_v29 = vpop.f32.mrb[10].mxu1 }
 0x16c   :  { %v2360_v31 = vpop.f32.mrb[11].mxu1 }
 0x16d   :  { %v1353_v33 = vadd.f32 %v2358_v28, %v1312_v24  ;;  %v2361_v34 = vadd.f32 %v2360_v31, %v2359_v29 }
 0x16f   :  { %v1356_v37 = vadd.f32 %v2361_v34, %v1315_v27 }
 0x189   :  { %v2378_v40 = vpop.f32.mrb[12].mxu1 }
 0x18a   :  { %v2379_v41 = vpop.f32.mrb[13].mxu1 }
 0x18b   :  { %v2380_v42 = vadd.f32 %v2379_v41, %v2378_v40  ;;  %v2381_v43 = vpop.f32.mrb[14].mxu1 }
 0x18c   :  { %v2382_v44 = vpop.f32.mrb[15].mxu1 }
 0x18d   :  { %v2383_v45 = vadd.f32 %v2382_v44, %v2381_v43  ;;  %v1394_v46 = vadd.f32 %v2380_v42, %v1353_v33  ;;  %v2698_v42 = vld [vmem:[#allocation7 + $0x100] ss:$8 sps:$4 sm:$0xff]   ;;  %v2703_v43 = vld [vmem:[#allocation7 + $0x114] ss:$8 sps:$4 sm:$0xff]   ;;  %v2701_v44 = vld [vmem:[#allocation7 + $0x110] ss:$8 sps:$4 sm:$0xff]  }
 0x18f   :  { %v1397_v47 = vadd.f32 %v2383_v45, %v1356_v37  ;;  %v2706_v45 = vld [vmem:[#allocation7 + $0x124] ss:$8 sps:$4 sm:$0xff]  }
 0x191   :  { %v1434_v50 = vpop.f32.mrb[16].mxu1 }
 0x192   :  { %v1435_v52 = vadd.f32 %v1434_v50, %v1394_v46  ;;  %v2412_v54 = vpop.f32.mrb[17].mxu1  ;;  %v2704_v46 = vld [vmem:[#allocation7 + $0x120] ss:$8 sps:$4 sm:$0xff]   ;;  %v2707_v50 = vld [vmem:[#allocation7 + $0x130] ss:$8 sps:$4 sm:$0xff]  }
 0x193   :  { %v1437_v55 = vpop.f32.mrb[18].mxu1  ;;  %v2710_v54 = vld [vmem:[#allocation7 + $0x140] ss:$8 sps:$4 sm:$0xff]  }
 0x194   :  { %v1443_v56 = vsub.f32 0.0, %v1435_v52  ;;  %v1438_v57 = vadd.f32 %v1437_v55, %v1397_v47  ;;  %v2413_v58 = vpop.f32.mrb[19].mxu1  ;;  %v2709_v47 = vld [vmem:[#allocation7 + $0x134] ss:$8 sps:$4 sm:$0xff]   ;;  %v2712_v52 = vld [vmem:[#allocation7 + $0x144] ss:$8 sps:$4 sm:$0xff]  }
 0x195   :  { %v2715_v55 = vld [vmem:[#allocation7 + $0x154] ss:$8 sps:$4 sm:$0xff]  }
 0x196   :  { %v1451_v59 = vmul.f32 1.442695, %v1443_v56  ;;  %v1446_v60 = vsub.f32 0.0, %v1438_v57  ;;  %v2713_v56 = vld [vmem:[#allocation7 + $0x150] ss:$8 sps:$4 sm:$0xff]  }
 0x197   :  { %v2718_v57 = vld [vmem:[#allocation7 + $0x164] ss:$8 sps:$4 sm:$0xff]   ;;  %v2721_v58 = vld [vmem:[#allocation7 + $0x174] ss:$8 sps:$4 sm:$0xff]  }
 0x198   :  { %2738 = vpow2.f32 %v1451_v59  ;;  %v1457_v61 = vmul.f32 1.442695, %v1446_v60  ;;  %v2719_v59 = vld [vmem:[#allocation7 + $0x170] ss:$8 sps:$4 sm:$0xff]   ;;  %v2722_v60 = vld [vmem:[#allocation8 + $0x40] sm:$0xff]  }
 0x199   :  { %2386 = vmatprep.subr.bf16.mxu0 %v2722_v60 }
 0x19a   :  { %2740 = vpow2.f32 %v1457_v61  ;;  %v2723_v61 = vld [vmem:[#allocation8] sm:$0xff]  }
 0x19b   :  { %2387 = vmatpush3.bf16.msra.mxu0 %v2723_v61 }
 0x1a2   :  { %v2739_v62 = vpop.eup %2738 }
 0x1a3   :  { %v1461_v63 = vadd.f32 1.0, %v2739_v62  ;;  %v2724_v62 = vld [vmem:[#allocation8 + $0x48] sm:$0xff]  }
 0x1a4   :  { %v2741_v1 = vpop.eup %2740  ;;  %2388 = vmatprep.subr.bf16.mxu0 %v2724_v62 }
 0x1a5   :  { %2742 = vrcp.f32 %v1461_v63  ;;  %v1464_v2 = vadd.f32 1.0, %v2741_v1  ;;  %v2725_v63 = vld [vmem:[#allocation8 + $0x8] sm:$0xff]   ;;  %v2726_v1 = vld [vmem:[#allocation8 + $0x50] sm:$0xff]  }
 0x1a6   :  { %2389 = vmatpush3.bf16.msra.mxu0 %v2725_v63 }
 0x1a7   :  { %2744 = vrcp.f32 %v1464_v2  ;;  %v2727_v2 = vld [vmem:[#allocation8 + $0x10] sm:$0xff]   ;;  %2390 = vmatprep.subr.bf16.mxu0 %v2726_v1 }
 0x1aa   :  { %2391 = vmatpush3.bf16.msra.mxu0 %v2727_v2 }
 0x1af   :  { %v3044_v3 = vpop.eup %2742 }
 0x1b1   :  { %v3046_v4 = vpop.eup %2744 }
 0x1b2   :  { %v1473_v5 = vpack.c.bf16 %v3046_v4, %v3044_v3  ;;  %v2732_v3 = vld [vmem:[#allocation8 + $0x68] sm:$0xff]  }
 0x1b3   :  { %v2733_v4 = vld [vmem:[#allocation8 + $0x28] sm:$0xff]  }
 0x1e0   :  { %v1225_v11 = vpop.f32.mrb[0].mxu0 }
 0x1e1   :  { %v2414_v12 = vadd.f32 %v1225_v11, %v305_v8  ;;  %v1227_v14 = vpop.f32.mrb[1].mxu0  ;;  %v2730_v11 = vld [vmem:[#allocation8 + $0x60] sm:$0xff]  }
 0x1e2   :  { %v2416_v15 = vadd.f32 %v1227_v14, %v309_v9  ;;  %v1229_v16 = vpop.f32.mrb[2].mxu0  ;;  %v2735_v14 = vld [vmem:[#allocation8 + $0x30] sm:$0xff]  }
 0x1e3   :  { %v2415_v18 = vadd.f32 %v2414_v12, %v3026_v48  ;;  %v2418_v19 = vadd.f32 %v1229_v16, %v305_v8  ;;  %v1231_v21 = vpop.f32.mrb[3].mxu0  ;;  %v2728_v8 = vld [vmem:[#allocation8 + $0x58] sm:$0xff]   ;;  %v2731_v12 = vld [vmem:[#allocation8 + $0x20] sm:$0xff]  }
 0x1e4   :  { %v2417_v22 = vadd.f32 %v2416_v15, %v3028_v49  ;;  %v2420_v23 = vadd.f32 %v1231_v21, %v309_v9  ;;  %v2729_v9 = vld [vmem:[#allocation8 + $0x18] sm:$0xff]   ;;  %2392 = vmatprep.subr.bf16.mxu0 %v2728_v8 }
 0x1e5   :  { %v1441_v24 = vsub.f32 0.0, %v2415_v18  ;;  %v2419_v20 = vadd.f32 %v2418_v19, %v3030_v51  ;;  %2393 = vmatpush3.bf16.msra.mxu0 %v2729_v9  ;;  %v2736_v15 = vld [vmem:[#allocation8 + $0x78] sm:$0xff]  }
 0x1e6   :  { %v1442_v25 = vsub.f32 0.0, %v2417_v22  ;;  %v2421_v26 = vadd.f32 %v2420_v23, %v3032_v53  ;;  %2394 = vmatprep.subr.bf16.mxu0 %v2730_v11  ;;  %v2737_v16 = vld [vmem:[#allocation8 + $0x38] sm:$0xff]  }
 0x1e7   :  { %v1447_v27 = vmul.f32 1.442695, %v1441_v24  ;;  %v1444_v17 = vsub.f32 0.0, %v2419_v20  ;;  %v1522_v18 = vld [vmem:[%s3096_s4] sm:$0x3] }
 0x1e8   :  { %v1449_v28 = vmul.f32 1.442695, %v1442_v25  ;;  %v1445_v29 = vsub.f32 0.0, %v2421_v26  ;;  %v1527_v19 = vrot.slane %v1522_v18, %v304_v6  ;;  %v1531_v21 = vrot.slane %v1522_v18, %v308_v7 }
 0x1e9   :  { %2746 = vpow2.f32 %v1447_v27  ;;  %v1453_v30 = vmul.f32 1.442695, %v1444_v17  ;;  %2395 = vmatpush3.bf16.msra.mxu0 %v2731_v12 }
 0x1ea   :  { %2748 = vpow2.f32 %v1449_v28  ;;  %v1455_v31 = vmul.f32 1.442695, %v1445_v29  ;;  %2396 = vmatprep.subr.bf16.mxu0 %v2732_v3 }
 0x1eb   :  { %2750 = vpow2.f32 %v1453_v30 }
 0x1ec   :  { %2752 = vpow2.f32 %v1455_v31 }
 0x1ed   :  { %2397 = vmatpush3.bf16.msra.mxu0 %v2733_v4 }
 0x1f3   :  { %v2747_v48 = vpop.eup %2746 }
 0x1f4   :  { %v2749_v32 = vpop.eup %2748  ;;  %v1459_v49 = vadd.f32 1.0, %v2747_v48 }
 0x1f5   :  { %v2751_v33 = vpop.eup %2750  ;;  %v1460_v34 = vadd.f32 1.0, %v2749_v32 }
 0x1f6   :  { %v2753_v35 = vpop.eup %2752  ;;  %2754 = vrcp.f32 %v1459_v49  ;;  %v1462_v51 = vadd.f32 1.0, %v2751_v33 }
 0x1f7   :  { %2756 = vrcp.f32 %v1460_v34  ;;  %v1463_v53 = vadd.f32 1.0, %v2753_v35 }
 0x1f8   :  { %2758 = vrcp.f32 %v1462_v51 }
 0x1f9   :  { %2760 = vrcp.f32 %v1463_v53 }
 0x200   :  { %v2755_v36 = vpop.eup %2754 }
 0x201   :  { %v2757_v37 = vpop.eup %2756 }
 0x202   :  { %v2759_v38 = vpop.eup %2758 }
 0x203   :  { %v2761_v39 = vpop.eup %2760  ;;  %v1471_v40 = vpack.c.bf16 %v2759_v38, %v2755_v36 }
 0x204   :  { %v1472_v41 = vpack.c.bf16 %v2761_v39, %v2757_v37 }
 0x206   :  { %1806 = vmatprep.mubr.bf16.mxu1 %v1472_v41 }
 0x207   :  { %1807 = vmatmul.mubr.bf16.vlgmr.msra.gmra.mrb[20].mxu1 %v1471_v40 }
 0x208   :  { %1818 = vmatpush1.bf16.msra.mxu1 %v2698_v42  ;;  %1849 = vmatprep.mubr.bf16.mxu1 %v2916_v0  ;;  %v2716_v0 = vld [vmem:[#allocation7 + $0x160] ss:$8 sps:$4 sm:$0xff]  }
 0x209   :  { %1819 = vmatprep.subr.bf16.mxu1 %v2703_v43  ;;  %v2059_v43 = vand.u32 127, %v302_v10 }
 0x20b   :  { %vm2060_vm2 = vcmp.lt.s32.totalorder %v2059_v43, 10 }
 0x20c   :  { %1820 = vmatpush1.bf16.msra.mxu1 %v2701_v44 }
 0x20d   :  { %1821 = vmatprep.subr.bf16.mxu1 %v2706_v45 }
 0x210   :  { %1822 = vmatpush1.bf16.msra.mxu1 %v2704_v46  ;;  %v2301_v46 = vld [vmem:[%s3098_s6] ss:$0 sm:$0xff]  ;;  %s2919_s6 = smov [#allocation10]  }
 0x211   :  { %1823 = vmatprep.subr.bf16.mxu1 %v2709_v47  ;;  %s2090_s10 = sshll.u32 %s2919_s6, 4  ;;  %s2091_s10 = int_to_ptr.vmem [resolvable:$true] %s2090_s10 }
 0x212   :  { %s2874_s11 = scalar_lea.vmem %s2091_s10, 256  ;;  %p2879_p5 = scmp.lt.s32.totalorder %s2091_s10, %s2091_s10 }
 0x213   :  { %p2875_p4 = scmp.ne.s32.totalorder %s2091_s10, %s2874_s11  ;;  %p2880_p6 = scmp.lt.s32.totalorder %s2874_s11, %s2874_s11 }
 0x214   :  { %1824 = vmatpush1.bf16.msra.mxu1 %v2707_v50 }
 0x215   :  { %1825 = vmatprep.subr.bf16.mxu1 %v2712_v52  ;;  %p2881_p7 = por %p2880_p6, %p2879_p5 }
 0x217   :  { %p2882_p8 = pnand %p2881_p7, %p2875_p4 }
 0x218   :  { %1826 = vmatpush1.bf16.msra.mxu1 %v2710_v54 }
 0x219   :  { %1827 = vmatprep.subr.bf16.mxu1 %v2715_v55 }
 0x21c   :  { %1828 = vmatpush1.bf16.msra.mxu1 %v2713_v56 }
 0x21d   :  { %1829 = vmatprep.subr.bf16.mxu1 %v2718_v57 }
 0x220   :  { %1830 = vmatpush1.bf16.msra.mxu1 %v2716_v0 }
 0x221   :  { %1831 = vmatprep.subr.bf16.mxu1 %v2721_v58 }
 0x224   :  { %1832 = vmatpush1.bf16.msra.mxu1 %v2719_v59 }
 0x227   :  { %1850 = vmatmul.mubr.bf16.vlgmr.msra.gmra.mrb[20].mxu1 %v1473_v5  ;;  %v2734_v5 = vld [vmem:[#allocation8 + $0x70] sm:$0xff]  }
 0x228   :  { %2398 = vmatprep.subr.bf16.mxu0 %v2734_v5 }
 0x229   :  { %2399 = vmatpush3.bf16.msra.mxu0 %v2735_v14 }
 0x22a   :  { %2400 = vmatprep.subr.bf16.mxu0 %v2736_v15 }
 0x22d   :  { %2401 = vmatpush3.bf16.msra.mxu0 %v2737_v16 }
 0x2fa   :  { %v1851_v22 = vpop.f32.mrb[20].mxu1 }
 0x2fb   :  { %v2422_v23 = vadd.f32 %v1851_v22, %v1527_v19  ;;  %v1853_v24 = vpop.f32.mrb[21].mxu1 }
 0x2fc   :  { %v2423_v20 = vadd.f32 %v1853_v24, %v1531_v21  ;;  %v1855_v25 = vpop.f32.mrb[22].mxu1 }
 0x2fd   :  { %v1860_v26 = vsub.f32 0.0, %v2422_v23  ;;  %v2424_v27 = vadd.f32 %v1855_v25, %v1527_v19  ;;  %v1857_v17 = vpop.f32.mrb[23].mxu1 }
 0x2fe   :  { %v1861_v28 = vsub.f32 0.0, %v2423_v20  ;;  %v2425_v29 = vadd.f32 %v1857_v17, %v1531_v21 }
 0x2ff   :  { %v1864_v30 = vmul.f32 1.442695, %v1860_v26  ;;  %v1862_v31 = vsub.f32 0.0, %v2424_v27 }
 0x300   :  { %v1866_v48 = vmul.f32 1.442695, %v1861_v28  ;;  %v1863_v32 = vsub.f32 0.0, %v2425_v29 }
 0x301   :  { %2762 = vpow2.f32 %v1864_v30  ;;  %v1868_v49 = vmul.f32 1.442695, %v1862_v31 }
 0x302   :  { %2764 = vpow2.f32 %v1866_v48  ;;  %v1870_v6 = vmul.f32 1.442695, %v1863_v32 }
 0x303   :  { %2766 = vpow2.f32 %v1868_v49 }
 0x304   :  { %2768 = vpow2.f32 %v1870_v6 }
 0x30b   :  { %v2763_v13 = vpop.eup %2762 }
 0x30c   :  { %v2765_v7 = vpop.eup %2764  ;;  %v1872_v33 = vadd.f32 1.0, %v2763_v13 }
 0x30d   :  { %v2767_v34 = vpop.eup %2766  ;;  %v1873_v35 = vadd.f32 1.0, %v2765_v7 }
 0x30e   :  { %v2769_v51 = vpop.eup %2768  ;;  %2770 = vrcp.f32 %v1872_v33  ;;  %v1874_v53 = vadd.f32 1.0, %v2767_v34 }
 0x30f   :  { %2772 = vrcp.f32 %v1873_v35  ;;  %v1875_v36 = vadd.f32 1.0, %v2769_v51 }
 0x310   :  { %2774 = vrcp.f32 %v1874_v53 }
 0x311   :  { %2776 = vrcp.f32 %v1875_v36 }
 0x318   :  { %v2771_v37 = vpop.eup %2770 }
 0x319   :  { %v2773_v38 = vpop.eup %2772 }
 0x31a   :  { %v2775_v39 = vpop.eup %2774 }
 0x31b   :  { %v2777_v40 = vpop.eup %2776  ;;  %v1880_v41 = vpack.c.bf16 %v2775_v39, %v2771_v37 }
 0x31c   :  { %v1881_v42 = vpack.c.bf16 %v2777_v40, %v2773_v38 }
 0x31e   :  { %2049 = vmatprep.mubr.bf16.mxu0 %v1881_v42 }
 0x31f   :  { %2050 = vmatmul.mubr.bf16.vlgmr.msra.gmra.mrb[4].mxu0 %v1880_v41 }
 0x3f2   :  { %v2402_v44 = vpop.f32.mrb[4].mxu0 }
 0x3f3   :  { %v2403_v45 = vpop.f32.mrb[5].mxu0 }
 0x3f4   :  { %v2404_v47 = vadd.f32 %v2403_v45, %v2402_v44  ;;  %v2405_v50 = vpop.f32.mrb[6].mxu0 }
 0x3f5   :  { %v2406_v52 = vpop.f32.mrb[7].mxu0 }
 0x3f6   :  { %v2407_v54 = vadd.f32 %v2406_v52, %v2405_v50  ;;  %v2052_v55 = vadd.f32 %v2404_v47, %v2301_v46 }
 0x3f8   :  { %v2061_v56 = vsel %vm2060_vm2, %v2052_v55, -inf  ;;  %v2055_v57 = vadd.f32 %v2407_v54, %v2301_v46 }
 0x3f9   :  { %2063 = vmax.xlane.f32.xlu0 %v2061_v56 }
 0x3fa   :  { %v2062_v0 = vsel %vm2060_vm2, %v2055_v57, -inf }
 0x3fd   :  { %2065 = vmax.xlane.f32.xlu0 %v2062_v0 }
 0x486   :  { %v2064_v58 = vpop.xlane.xlu0 %2063 }
 0x487   :  { %v2067_v59 = vsub.f32 %v2061_v56, %v2064_v58 }
 0x489   :  { %v2069_v10 = vmul.f32 1.442695, %v2067_v59 }
 0x48a   :  { %v2066_v60 = vpop.xlane.xlu0 %2065 }
 0x48b   :  { %v2068_v61 = vsub.f32 %v2062_v0, %v2066_v60  ;;  %2778 = vpow2.f32 %v2069_v10 }
 0x48d   :  { %v2071_v62 = vmul.f32 1.442695, %v2068_v61 }
 0x48f   :  { %2780 = vpow2.f32 %v2071_v62 }
 0x495   :  { %v2779_v63 = vpop.eup %2778 }
 0x496   :  { %2073 = vadd.xlane.f32.xlu1 %v2779_v63 }
 0x499   :  { %v2781_v1 = vpop.eup %2780 }
 0x49a   :  { %2075 = vadd.xlane.f32.xlu1 %v2781_v1 }
 0x523   :  { %v2074_v2 = vpop.xlane.xlu1 %2073 }
 0x524   :  { %2782 = vlog2.f32 %v2074_v2 }
 0x527   :  { %v2076_v8 = vpop.xlane.xlu1 %2075 }
 0x528   :  { %2784 = vlog2.f32 %v2076_v8 }
 0x52e   :  { %v2783_v9 = vpop.eup %2782 }
 0x52f   :  { %v2078_v11 = vmul.f32 0.6931472, %v2783_v9 }
 0x531   :  { %v2081_v12 = vsub.f32 %v2067_v59, %v2078_v11 }
 0x532   :  { %v2785_v3 = vpop.eup %2784 }
 0x533   :  { %2083 = vst [vmem:[#allocation10] sm:$0xff] %v2081_v12  ;;  %v2080_v4 = vmul.f32 0.6931472, %v2785_v3 }
 0x535   :  { %v2082_v5 = vsub.f32 %v2068_v61, %v2080_v4 }
 0x537   :  { %2084 = vst [vmem:[#allocation10 + $0x8] sm:$0xff] %v2082_v5 }
 0x538   :  { %2885 = shalt.err (!%p2882_p8)
}
 0x539   :  { %s2886_s14 = scalar_lea.hbm %s3099_s7, 256 }
 0x53a   :  { %p2887_p9 = scmp.ne.s32.totalorder %s3099_s7, %s2886_s14  ;;  %p2890_p10 = scmp.lt.u32.totalorder %s2886_s14, %s3099_s7 }
 0x53c   :  { %p2892_p11 = pnand %p2890_p10, %p2887_p9 }
 0x53e   :  { %2895 = shalt.err (!%p2892_p11)
}
 0x53f   :  { %2096 = dma.vmem_to_hbm [thread:$0]  %s2091_s10, 256, %s3099_s7, [#allocation4], %s2911_s0, %s2911_s0, %s2912_s15  }
 0x540   :  { %2902 = dma.done.wait [#allocation4], 256  }
 0x541   :  { %2903 = vsyncadd [#allocation4], 4294967040 }
 0x542   :  { %2100 = vsyncpa [#allocation3], 1 }
 0x543   :  { %2101 = vsyncpa [#allocation6], 1 }
 0x544   :  { %2102 = vsyncpa [#allocation9], 1 }
 0x545   :  { %2103 = vsyncpa [#allocation4], 1 }

</bundles_post_ra>
